<compile_context>
chip_gen: v5e
topology: v5e:2x2
jax: 0.10.0
libtpu: 0.0.40
codegen_flags: <defaults>
</compile_context>

<pallas_src>
import jax
import jax.numpy as jnp
from jax.experimental import pallas as pl
from jax.experimental.pallas import tpu as pltpu

BN_EPS = 1e-5
NEG_SLOPE = 0.2  # LeakyReLU slope


def _round_up(x, m):
    return ((x + m - 1) // m) * m


# ---------------------------------------------------------------------------
# Pallas kernel (static dims / slab layouts captured in a closure)
# ---------------------------------------------------------------------------
def _make_kernel(B, V, Vp, LC, H, XMID, s_layout, w_layout, use_mxu_eu):
    inv_b = 1.0 / float(B)

    def bn_lrelu(y, gamma, beta):
        """BatchNorm1d (training stats, one fused pass) + LeakyReLU(0.2).
        y:(B,c), gamma/beta:(1,c)."""
        s1 = jnp.sum(y, axis=0, keepdims=True)
        s2 = jnp.sum(y * y, axis=0, keepdims=True)
        mean = s1 * inv_b
        var = s2 * inv_b - mean * mean                  # biased variance, one pass
        scale = gamma * jax.lax.rsqrt(var + BN_EPS)     # fold BN affine
        y = y * scale + (beta - mean * scale)
        return jnp.maximum(y, NEG_SLOPE * y)            # LeakyReLU(0.2)

    def kernel(res_ref, asr_ref, cus_ref, sprm_ref, wprm_ref, out_ref):
        # Static ref slices at point of use (bounded live ranges, aligned rows).
        def s_sl(name):
            off, r, c = s_layout[name]
            return sprm_ref[off:off + r, :c]

        def w_sl(name):
            off, r, c = w_layout[name]
            return wprm_ref[off:off + r, :c]

        assorts = asr_ref[...]                          # (B, Vp) lane-dense
        cusf = cus_ref[...]                             # (B, LC)

        # ---- customer encoder: Linear -> BN -> LeakyReLU, twice -------------
        cp1 = s_sl("cp1")                               # (3, H) = [bias;gamma;beta]
        y = jnp.dot(cusf, s_sl("cw1"), preferred_element_type=jnp.float32) + cp1[0:1, :]
        cf = bn_lrelu(y, cp1[1:2, :], cp1[2:3, :])
        cp2 = s_sl("cp2")
        y = jnp.dot(cf, s_sl("cw2"), preferred_element_type=jnp.float32) + cp2[0:1, :]
        cf = bn_lrelu(y, cp2[1:2, :], cp2[2:3, :])      # (B, H)

        # ---- encoded_utils[b, v] = <cus_features[b], prod_features[v]> ------
        # pfT is the precomputed (hoisted) product-encoder output, (H, Vp).
        pfT = w_sl("pfT")
        if use_mxu_eu:
            # Production-scale V: use the otherwise-idle MXU.
            eu = jnp.dot(cf, pfT, preferred_element_type=jnp.float32)
        else:
            # Toy V: K = H = 3 -> cheap VPU broadcast-MAC, skip the MXU round-trip.
            eu = cf[:, 0:1] * pfT[0:1, :]
            for h in range(1, H):
                eu = eu + cf[:, h:h + 1] * pfT[h:h + 1, :]       # (B, Vp)

        # ---- Res: Linear(2,1) over (encoded_util, assort), then sigmoid -----
        r = eu * res_ref[0] + assorts * res_ref[1] + res_ref[2]
        prob = pl.reciprocal(1.0 + jnp.exp(-r), approx=False)    # EUP recip

        # ---- CrossEffect MLP: V -> XMID -> V ---------------------------------
        # xw1 stored transposed (XMID, Vp): contract prob's V axis with axis 1.
        xp1 = s_sl("xp1")
        y = jax.lax.dot_general(
            prob, w_sl("xw1T"),
            dimension_numbers=(((1,), (1,)), ((), ())),
            preferred_element_type=jnp.float32) + xp1[0:1, :]
        h1 = bn_lrelu(y, xp1[1:2, :], xp1[2:3, :])      # (B, XMID)

        xp2 = w_sl("xp2")
        y = jnp.dot(h1, w_sl("xw2"), preferred_element_type=jnp.float32) + xp2[0:1, :]
        prob = bn_lrelu(y, xp2[1:2, :], xp2[2:3, :])    # (B, Vp); padded lanes -> 0

        # ---- softmax * assorts / renormalize ---------------------------------
        # The softmax denominator cancels with the final renormalization:
        #   out = (exp(x - max) * assorts) / sum(exp(x - max) * assorts)
        p = jnp.exp(prob - jnp.max(prob, axis=-1, keepdims=True))
        p = p * assorts                                  # zeroes padded lanes too
        denom = jnp.sum(p, axis=-1, keepdims=True)
        out_ref[...] = p * pl.reciprocal(denom, approx=False)   # lane-dense store

    return kernel


# ---------------------------------------------------------------------------
# Slab packing: per-tensor 8-row alignment, fixed lane-dense width (one DMA each)
# ---------------------------------------------------------------------------
def _pack_slab(tensors, width):
    """tensors: ordered dict name -> 2D f32 array (cols <= width).
    Each tensor's row block is padded to a multiple of 8 rows so every slice
    starts on a sublane-tile boundary.  Returns (slab, layout)."""
    rows, layout, off = [], {}, 0
    for name, t in tensors.items():
        t = jnp.asarray(t, jnp.float32)
        r, c = int(t.shape[0]), int(t.shape[1])
        rp = _round_up(r, 8)
        layout[name] = (off, r, c)
        rows.append(jnp.pad(t, ((0, rp - r), (0, width - c))))
        off += rp
    return jnp.concatenate(rows, axis=0), layout


def prepare_packed(products_full, params):
    """Hoist the (static) product encoder out of the kernel and pack parameters
    into a lane-dense wide slab + a small slab + a 3-scalar SMEM vector."""
    # Product encoder depends only on products + weights -> precompute once.
    pf = _lin_bn_lrelu_ref(products_full, params["pw1"], params["pp1"])
    pf = _lin_bn_lrelu_ref(pf, params["pw2"], params["pp2"])     # (V, H)

    V = int(products_full.shape[0])
    Vp = _round_up(V, 128)
    LC = int(params["cw1"].shape[0])
    H = int(params["cw1"].shape[1])
    XMID = int(params["xw1"].shape[1])
    pad_v = ((0, 0), (0, Vp - V))

    # Wide (lane width = Vp) tensors.  Zero padding on lanes >= V keeps padded
    # products exactly zero through the whole network.
    wide_tensors = {
        "pfT": jnp.pad(pf.T, pad_v),                     # (H, Vp)
        "xw1T": jnp.pad(params["xw1"].T, pad_v),         # (XMID, Vp)
        "xw2": jnp.pad(params["xw2"], pad_v),            # (XMID, Vp)
        "xp2": jnp.pad(params["xp2"], pad_v),            # (3, Vp) [bias;gamma;beta]
    }
    wide_slab, w_layout = _pack_slab(wide_tensors, width=Vp)

    small_tensors = {
        "cw1": params["cw1"], "cp1": params["cp1"],
        "cw2": params["cw2"], "cp2": params["cp2"],
        "xp1": params["xp1"],
    }
    small_slab, s_layout = _pack_slab(small_tensors, width=128)

    return dict(small=small_slab, wide=wide_slab,
                s_layout=s_layout, w_layout=w_layout,
                res=params["res"], V=V, Vp=Vp, LC=LC, H=H, XMID=XMID)


# ---------------------------------------------------------------------------
# Wrapper: 5-input pallas_call (res SMEM; assorts / cusf / two slabs VMEM)
# ---------------------------------------------------------------------------
def utils_model_forward(IN, packed):
    B = int(IN.shape[0])
    V, Vp, LC, H, XMID = (packed["V"], packed["Vp"], packed["LC"],
                          packed["H"], packed["XMID"])

    # Split + lane-pad in the wrapper (layout plumbing), so the kernel never
    # does a cross-lane slice of IN and all V-wide ops are lane-dense.
    assorts = jnp.pad(IN[:, :V], ((0, 0), (0, Vp - V)))
    cusf = IN[:, V:V + LC]

    kernel = _make_kernel(B, V, Vp, LC, H, XMID,
                          packed["s_layout"], packed["w_layout"],
                          use_mxu_eu=(V >= 128))

    vmem = pl.BlockSpec(memory_space=pltpu.MemorySpace.VMEM)
    smem = pl.BlockSpec(memory_space=pltpu.MemorySpace.SMEM)

    out_p = pl.pallas_call(
        kernel,
        out_shape=jax.ShapeDtypeStruct((B, Vp), jnp.float32),
        in_specs=[smem, vmem, vmem, vmem, vmem],
        out_specs=vmem,
        # NOTE: working set here is a few tens of KiB, so default scoped VMEM is
        # ample; set vmem_limit_bytes only once a batch-tiled grid is added.
    )(packed["res"], assorts, cusf, packed["small"], packed["wide"])
    return out_p[:, :V]


# ---------------------------------------------------------------------------
# Deterministic parameter init (PyTorch-Linear-style uniform bounds)
# ---------------------------------------------------------------------------
def _linear_init(key, fan_in, fan_out):
    kw, kb = jax.random.split(key)
    bound = 1.0 / float(fan_in) ** 0.5
    w = jax.random.uniform(kw, (fan_in, fan_out), jnp.float32, -bound, bound)
    b = jax.random.uniform(kb, (fan_out,), jnp.float32, -bound, bound)
    return w, b


def _lin_bn_params(key, fan_in, fan_out):
    w, b = _linear_init(key, fan_in, fan_out)
    gamma = jnp.ones((fan_out,), jnp.float32)
    beta = jnp.zeros((fan_out,), jnp.float32)
    return w, jnp.stack([b, gamma, beta], axis=0)   # (3, out) = [bias; gamma; beta]


# ---------------------------------------------------------------------------
# Pure-JAX reference (correctness oracle; also used to hoist the prod encoder)
# ---------------------------------------------------------------------------
def _lin_bn_lrelu_ref(x, w, p):
    y = x @ w + p[0]
    mean = y.mean(0, keepdims=True)
    var = ((y - mean) ** 2).mean(0, keepdims=True)
    y = (y - mean) / jnp.sqrt(var + BN_EPS)
    y = y * p[1] + p[2]
    return jnp.where(y > 0, y, NEG_SLOPE * y)


def forward_ref(IN, products_full, params):
    V = products_full.shape[0]
    assorts, cusf = IN[:, :V], IN[:, V:]
    pf = products_full
    pf = _lin_bn_lrelu_ref(pf, params["pw1"], params["pp1"])
    pf = _lin_bn_lrelu_ref(pf, params["pw2"], params["pp2"])
    cf = _lin_bn_lrelu_ref(cusf, params["cw1"], params["cp1"])
    cf = _lin_bn_lrelu_ref(cf, params["cw2"], params["cp2"])
    eu = cf @ pf.T
    r = eu * params["res"][0] + assorts * params["res"][1] + params["res"][2]
    prob = jax.nn.sigmoid(r)
    prob = _lin_bn_lrelu_ref(prob, params["xw1"], params["xp1"])
    prob = _lin_bn_lrelu_ref(prob, params["xw2"], params["xp2"])
    prob = jax.nn.softmax(prob, axis=-1)
    prob = prob * assorts
    return prob / prob.sum(-1, keepdims=True)


# ---------------------------------------------------------------------------
if __name__ == "__main__":
    key = jax.random.PRNGKey(0)
    B, V, LP, LC = 8, 8, 3, 5          # batch, Vec_Len, Len_prodFeature, Len_customerFeature
    H = 3                              # encoder output width (cus/prod midLayers[-1])
    XMID = 5                           # CrossEffectLayers[0]
    keys = jax.random.split(key, 10)

    # products: (Vec_Len-1, Len_prodFeature), zero row prepended as in __init__
    products = jax.random.normal(keys[0], (V - 1, LP), jnp.float32)
    products_full = jnp.concatenate([jnp.zeros((1, LP), jnp.float32), products], axis=0)

    pw1, pp1 = _lin_bn_params(keys[1], LP, H)
    pw2, pp2 = _lin_bn_params(keys[2], H, H)
    cw1, cp1 = _lin_bn_params(keys[3], LC, H)
    cw2, cp2 = _lin_bn_params(keys[4], H, H)
    xw1, xp1 = _lin_bn_params(keys[5], V, XMID)
    xw2, xp2 = _lin_bn_params(keys[6], XMID, V)
    rw, rb = _linear_init(keys[7], 2, 1)
    res = jnp.array([rw[0, 0], rw[1, 0], rb[0]], jnp.float32)

    params = dict(pw1=pw1, pp1=pp1, pw2=pw2, pp2=pp2,
                  cw1=cw1, cp1=cp1, cw2=cw2, cp2=cp2,
                  xw1=xw1, xp1=xp1, xw2=xw2, xp2=xp2, res=res)

    # input IN = [assortment one-hots | customer features]
    assorts = jax.random.bernoulli(keys[8], 0.6, (B, V)).astype(jnp.float32)
    assorts = assorts.at[:, 0].set(1.0)   # "no-purchase" product always available
    cusFs = jax.random.normal(keys[9], (B, LC), jnp.float32)
    IN = jnp.concatenate([assorts, cusFs], axis=1)   # (B, V + LC)

    packed = prepare_packed(products_full, params)   # one-time param packing
    out = jax.block_until_ready(utils_model_forward(IN, packed))
    ref = forward_ref(IN, products_full, params)

    assert out.shape == (B, V), out.shape
    assert jnp.allclose(out, ref, atol=2e-5, rtol=2e-5), float(jnp.max(jnp.abs(out - ref)))
    print("KERNEL_OK")
</pallas_src>

<mosaic_0001>
module attributes {stable_mosaic.version = 11 : i64} {
  func.func @kernel(%arg0: memref<3xf32, #tpu.memory_space<smem>>, %arg1: memref<8x128xf32, #tpu.memory_space<vmem>>, %arg2: memref<8x5xf32, #tpu.memory_space<vmem>>, %arg3: memref<40x128xf32, #tpu.memory_space<vmem>>, %arg4: memref<32x128xf32, #tpu.memory_space<vmem>>, %arg5: memref<8x128xf32, #tpu.memory_space<vmem>>) attributes {dimension_semantics = [], scalar_prefetch = 0 : i64, scratch_operands = 0 : i64, tpu.core_type = #tpu.core_type<tc>} {
    %c0 = arith.constant 0 : index
    %c0_0 = arith.constant 0 : index
    %0 = vector.load %arg1[%c0, %c0_0] : memref<8x128xf32, #tpu.memory_space<vmem>>, vector<8x128xf32>
    %c0_1 = arith.constant 0 : index
    %c0_2 = arith.constant 0 : index
    %1 = vector.load %arg2[%c0_1, %c0_2] : memref<8x5xf32, #tpu.memory_space<vmem>>, vector<8x5xf32>
    %c8 = arith.constant 8 : index
    %c0_3 = arith.constant 0 : index
    %2 = vector.load %arg3[%c8, %c0_3] : memref<40x128xf32, #tpu.memory_space<vmem>>, vector<3x3xf32>
    %c0_4 = arith.constant 0 : index
    %c0_5 = arith.constant 0 : index
    %3 = vector.load %arg3[%c0_4, %c0_5] : memref<40x128xf32, #tpu.memory_space<vmem>>, vector<5x3xf32>
    %cst = arith.constant dense<0.000000e+00> : vector<8x3xf32>
    %4 = tpu.matmul %1, %3, %cst {dimension_numbers = #tpu.dot_dimension_numbers<[1], [0], [0], [1], [0, 0, 1, 1], [], []>} : vector<8x5xf32>, vector<5x3xf32>, vector<8x3xf32> -> vector<8x3xf32>
    %5 = vector.extract_strided_slice %2 {offsets = [0, 0], sizes = [1, 3], strides = [1, 1]} : vector<3x3xf32> to vector<1x3xf32>
    %6 = vector.broadcast %5 : vector<1x3xf32> to vector<8x3xf32>
    %7 = arith.addf %4, %6 : vector<8x3xf32>
    %8 = vector.extract_strided_slice %2 {offsets = [1, 0], sizes = [1, 3], strides = [1, 1]} : vector<3x3xf32> to vector<1x3xf32>
    %9 = vector.extract_strided_slice %2 {offsets = [2, 0], sizes = [1, 3], strides = [1, 1]} : vector<3x3xf32> to vector<1x3xf32>
    %cst_6 = arith.constant dense<0.000000e+00> : vector<3xf32>
    %10 = vector.multi_reduction <add>, %7, %cst_6 [0] : vector<8x3xf32> to vector<3xf32>
    %11 = vector.shape_cast %10 : vector<3xf32> to vector<1x3xf32>
    %12 = arith.mulf %7, %7 : vector<8x3xf32>
    %cst_7 = arith.constant dense<0.000000e+00> : vector<3xf32>
    %13 = vector.multi_reduction <add>, %12, %cst_7 [0] : vector<8x3xf32> to vector<3xf32>
    %14 = vector.shape_cast %13 : vector<3xf32> to vector<1x3xf32>
    %cst_8 = arith.constant 1.250000e-01 : f32
    %15 = vector.broadcast %cst_8 : f32 to vector<1x3xf32>
    %16 = arith.mulf %11, %15 : vector<1x3xf32>
    %cst_9 = arith.constant 1.250000e-01 : f32
    %17 = vector.broadcast %cst_9 : f32 to vector<1x3xf32>
    %18 = arith.mulf %14, %17 : vector<1x3xf32>
    %19 = arith.mulf %16, %16 : vector<1x3xf32>
    %20 = arith.subf %18, %19 : vector<1x3xf32>
    %cst_10 = arith.constant 9.99999974E-6 : f32
    %21 = vector.broadcast %cst_10 : f32 to vector<1x3xf32>
    %22 = arith.addf %20, %21 : vector<1x3xf32>
    %23 = math.rsqrt %22 : vector<1x3xf32>
    %24 = arith.mulf %8, %23 : vector<1x3xf32>
    %25 = vector.broadcast %24 : vector<1x3xf32> to vector<8x3xf32>
    %26 = arith.mulf %7, %25 : vector<8x3xf32>
    %27 = arith.mulf %16, %24 : vector<1x3xf32>
    %28 = arith.subf %9, %27 : vector<1x3xf32>
    %29 = vector.broadcast %28 : vector<1x3xf32> to vector<8x3xf32>
    %30 = arith.addf %26, %29 : vector<8x3xf32>
    %cst_11 = arith.constant 2.000000e-01 : f32
    %31 = vector.broadcast %cst_11 : f32 to vector<8x3xf32>
    %32 = arith.mulf %31, %30 : vector<8x3xf32>
    %33 = arith.maximumf %30, %32 : vector<8x3xf32>
    %c24 = arith.constant 24 : index
    %c0_12 = arith.constant 0 : index
    %34 = vector.load %arg3[%c24, %c0_12] : memref<40x128xf32, #tpu.memory_space<vmem>>, vector<3x3xf32>
    %c16 = arith.constant 16 : index
    %c0_13 = arith.constant 0 : index
    %35 = vector.load %arg3[%c16, %c0_13] : memref<40x128xf32, #tpu.memory_space<vmem>>, vector<3x3xf32>
    %cst_14 = arith.constant dense<0.000000e+00> : vector<8x3xf32>
    %36 = tpu.matmul %33, %35, %cst_14 {dimension_numbers = #tpu.dot_dimension_numbers<[1], [0], [0], [1], [0, 0, 1, 1], [], []>} : vector<8x3xf32>, vector<3x3xf32>, vector<8x3xf32> -> vector<8x3xf32>
    %37 = vector.extract_strided_slice %34 {offsets = [0, 0], sizes = [1, 3], strides = [1, 1]} : vector<3x3xf32> to vector<1x3xf32>
    %38 = vector.broadcast %37 : vector<1x3xf32> to vector<8x3xf32>
    %39 = arith.addf %36, %38 : vector<8x3xf32>
    %40 = vector.extract_strided_slice %34 {offsets = [1, 0], sizes = [1, 3], strides = [1, 1]} : vector<3x3xf32> to vector<1x3xf32>
    %41 = vector.extract_strided_slice %34 {offsets = [2, 0], sizes = [1, 3], strides = [1, 1]} : vector<3x3xf32> to vector<1x3xf32>
    %cst_15 = arith.constant dense<0.000000e+00> : vector<3xf32>
    %42 = vector.multi_reduction <add>, %39, %cst_15 [0] : vector<8x3xf32> to vector<3xf32>
    %43 = vector.shape_cast %42 : vector<3xf32> to vector<1x3xf32>
    %44 = arith.mulf %39, %39 : vector<8x3xf32>
    %cst_16 = arith.constant dense<0.000000e+00> : vector<3xf32>
    %45 = vector.multi_reduction <add>, %44, %cst_16 [0] : vector<8x3xf32> to vector<3xf32>
    %46 = vector.shape_cast %45 : vector<3xf32> to vector<1x3xf32>
    %cst_17 = arith.constant 1.250000e-01 : f32
    %47 = vector.broadcast %cst_17 : f32 to vector<1x3xf32>
    %48 = arith.mulf %43, %47 : vector<1x3xf32>
    %cst_18 = arith.constant 1.250000e-01 : f32
    %49 = vector.broadcast %cst_18 : f32 to vector<1x3xf32>
    %50 = arith.mulf %46, %49 : vector<1x3xf32>
    %51 = arith.mulf %48, %48 : vector<1x3xf32>
    %52 = arith.subf %50, %51 : vector<1x3xf32>
    %cst_19 = arith.constant 9.99999974E-6 : f32
    %53 = vector.broadcast %cst_19 : f32 to vector<1x3xf32>
    %54 = arith.addf %52, %53 : vector<1x3xf32>
    %55 = math.rsqrt %54 : vector<1x3xf32>
    %56 = arith.mulf %40, %55 : vector<1x3xf32>
    %57 = vector.broadcast %56 : vector<1x3xf32> to vector<8x3xf32>
    %58 = arith.mulf %39, %57 : vector<8x3xf32>
    %59 = arith.mulf %48, %56 : vector<1x3xf32>
    %60 = arith.subf %41, %59 : vector<1x3xf32>
    %61 = vector.broadcast %60 : vector<1x3xf32> to vector<8x3xf32>
    %62 = arith.addf %58, %61 : vector<8x3xf32>
    %cst_20 = arith.constant 2.000000e-01 : f32
    %63 = vector.broadcast %cst_20 : f32 to vector<8x3xf32>
    %64 = arith.mulf %63, %62 : vector<8x3xf32>
    %65 = arith.maximumf %62, %64 : vector<8x3xf32>
    %c0_21 = arith.constant 0 : index
    %c0_22 = arith.constant 0 : index
    %66 = vector.load %arg4[%c0_21, %c0_22] : memref<32x128xf32, #tpu.memory_space<vmem>>, vector<3x128xf32>
    %67 = vector.extract_strided_slice %65 {offsets = [0, 0], sizes = [8, 1], strides = [1, 1]} : vector<8x3xf32> to vector<8x1xf32>
    %68 = vector.extract_strided_slice %66 {offsets = [0, 0], sizes = [1, 128], strides = [1, 1]} : vector<3x128xf32> to vector<1x128xf32>
    %69 = vector.broadcast %67 : vector<8x1xf32> to vector<8x128xf32>
    %70 = vector.broadcast %68 : vector<1x128xf32> to vector<8x128xf32>
    %71 = arith.mulf %69, %70 : vector<8x128xf32>
    %72 = vector.extract_strided_slice %65 {offsets = [0, 1], sizes = [8, 1], strides = [1, 1]} : vector<8x3xf32> to vector<8x1xf32>
    %73 = vector.extract_strided_slice %66 {offsets = [1, 0], sizes = [1, 128], strides = [1, 1]} : vector<3x128xf32> to vector<1x128xf32>
    %74 = vector.broadcast %72 : vector<8x1xf32> to vector<8x128xf32>
    %75 = vector.broadcast %73 : vector<1x128xf32> to vector<8x128xf32>
    %76 = arith.mulf %74, %75 : vector<8x128xf32>
    %77 = arith.addf %71, %76 : vector<8x128xf32>
    %78 = vector.extract_strided_slice %65 {offsets = [0, 2], sizes = [8, 1], strides = [1, 1]} : vector<8x3xf32> to vector<8x1xf32>
    %79 = vector.extract_strided_slice %66 {offsets = [2, 0], sizes = [1, 128], strides = [1, 1]} : vector<3x128xf32> to vector<1x128xf32>
    %80 = vector.broadcast %78 : vector<8x1xf32> to vector<8x128xf32>
    %81 = vector.broadcast %79 : vector<1x128xf32> to vector<8x128xf32>
    %82 = arith.mulf %80, %81 : vector<8x128xf32>
    %83 = arith.addf %77, %82 : vector<8x128xf32>
    %c0_23 = arith.constant 0 : index
    %84 = memref.load %arg0[%c0_23] : memref<3xf32, #tpu.memory_space<smem>>
    %85 = vector.broadcast %84 : f32 to vector<8x128xf32>
    %86 = arith.mulf %83, %85 : vector<8x128xf32>
    %c1 = arith.constant 1 : index
    %87 = memref.load %arg0[%c1] : memref<3xf32, #tpu.memory_space<smem>>
    %88 = vector.broadcast %87 : f32 to vector<8x128xf32>
    %89 = arith.mulf %0, %88 : vector<8x128xf32>
    %90 = arith.addf %86, %89 : vector<8x128xf32>
    %c2 = arith.constant 2 : index
    %91 = memref.load %arg0[%c2] : memref<3xf32, #tpu.memory_space<smem>>
    %92 = vector.broadcast %91 : f32 to vector<8x128xf32>
    %93 = arith.addf %90, %92 : vector<8x128xf32>
    %cst_24 = arith.constant 0.000000e+00 : f32
    %94 = vector.broadcast %cst_24 : f32 to vector<8x128xf32>
    %95 = arith.subf %94, %93 : vector<8x128xf32>
    %96 = math.exp %95 : vector<8x128xf32>
    %cst_25 = arith.constant 1.000000e+00 : f32
    %97 = vector.broadcast %cst_25 : f32 to vector<8x128xf32>
    %98 = arith.addf %97, %96 : vector<8x128xf32>
    %99 = tpu.reciprocal %98 : vector<8x128xf32> -> vector<8x128xf32>
    %c32 = arith.constant 32 : index
    %c0_26 = arith.constant 0 : index
    %100 = vector.load %arg3[%c32, %c0_26] : memref<40x128xf32, #tpu.memory_space<vmem>>, vector<3x5xf32>
    %c8_27 = arith.constant 8 : index
    %c0_28 = arith.constant 0 : index
    %101 = vector.load %arg4[%c8_27, %c0_28] : memref<32x128xf32, #tpu.memory_space<vmem>>, vector<5x128xf32>
    %cst_29 = arith.constant dense<0.000000e+00> : vector<8x5xf32>
    %102 = tpu.matmul %99, %101, %cst_29 {dimension_numbers = #tpu.dot_dimension_numbers<[1], [1], [0], [0], [0, 0, 1, 0], [], []>} : vector<8x128xf32>, vector<5x128xf32>, vector<8x5xf32> -> vector<8x5xf32>
    %103 = vector.extract_strided_slice %100 {offsets = [0, 0], sizes = [1, 5], strides = [1, 1]} : vector<3x5xf32> to vector<1x5xf32>
    %104 = vector.broadcast %103 : vector<1x5xf32> to vector<8x5xf32>
    %105 = arith.addf %102, %104 : vector<8x5xf32>
    %106 = vector.extract_strided_slice %100 {offsets = [1, 0], sizes = [1, 5], strides = [1, 1]} : vector<3x5xf32> to vector<1x5xf32>
    %107 = vector.extract_strided_slice %100 {offsets = [2, 0], sizes = [1, 5], strides = [1, 1]} : vector<3x5xf32> to vector<1x5xf32>
    %cst_30 = arith.constant dense<0.000000e+00> : vector<5xf32>
    %108 = vector.multi_reduction <add>, %105, %cst_30 [0] : vector<8x5xf32> to vector<5xf32>
    %109 = vector.shape_cast %108 : vector<5xf32> to vector<1x5xf32>
    %110 = arith.mulf %105, %105 : vector<8x5xf32>
    %cst_31 = arith.constant dense<0.000000e+00> : vector<5xf32>
    %111 = vector.multi_reduction <add>, %110, %cst_31 [0] : vector<8x5xf32> to vector<5xf32>
    %112 = vector.shape_cast %111 : vector<5xf32> to vector<1x5xf32>
    %cst_32 = arith.constant 1.250000e-01 : f32
    %113 = vector.broadcast %cst_32 : f32 to vector<1x5xf32>
    %114 = arith.mulf %109, %113 : vector<1x5xf32>
    %cst_33 = arith.constant 1.250000e-01 : f32
    %115 = vector.broadcast %cst_33 : f32 to vector<1x5xf32>
    %116 = arith.mulf %112, %115 : vector<1x5xf32>
    %117 = arith.mulf %114, %114 : vector<1x5xf32>
    %118 = arith.subf %116, %117 : vector<1x5xf32>
    %cst_34 = arith.constant 9.99999974E-6 : f32
    %119 = vector.broadcast %cst_34 : f32 to vector<1x5xf32>
    %120 = arith.addf %118, %119 : vector<1x5xf32>
    %121 = math.rsqrt %120 : vector<1x5xf32>
    %122 = arith.mulf %106, %121 : vector<1x5xf32>
    %123 = vector.broadcast %122 : vector<1x5xf32> to vector<8x5xf32>
    %124 = arith.mulf %105, %123 : vector<8x5xf32>
    %125 = arith.mulf %114, %122 : vector<1x5xf32>
    %126 = arith.subf %107, %125 : vector<1x5xf32>
    %127 = vector.broadcast %126 : vector<1x5xf32> to vector<8x5xf32>
    %128 = arith.addf %124, %127 : vector<8x5xf32>
    %cst_35 = arith.constant 2.000000e-01 : f32
    %129 = vector.broadcast %cst_35 : f32 to vector<8x5xf32>
    %130 = arith.mulf %129, %128 : vector<8x5xf32>
    %131 = arith.maximumf %128, %130 : vector<8x5xf32>
    %c24_36 = arith.constant 24 : index
    %c0_37 = arith.constant 0 : index
    %132 = vector.load %arg4[%c24_36, %c0_37] : memref<32x128xf32, #tpu.memory_space<vmem>>, vector<3x128xf32>
    %c16_38 = arith.constant 16 : index
    %c0_39 = arith.constant 0 : index
    %133 = vector.load %arg4[%c16_38, %c0_39] : memref<32x128xf32, #tpu.memory_space<vmem>>, vector<5x128xf32>
    %cst_40 = arith.constant dense<0.000000e+00> : vector<8x128xf32>
    %134 = tpu.matmul %131, %133, %cst_40 {dimension_numbers = #tpu.dot_dimension_numbers<[1], [0], [0], [1], [0, 0, 1, 1], [], []>} : vector<8x5xf32>, vector<5x128xf32>, vector<8x128xf32> -> vector<8x128xf32>
    %135 = vector.extract_strided_slice %132 {offsets = [0, 0], sizes = [1, 128], strides = [1, 1]} : vector<3x128xf32> to vector<1x128xf32>
    %136 = vector.broadcast %135 : vector<1x128xf32> to vector<8x128xf32>
    %137 = arith.addf %134, %136 : vector<8x128xf32>
    %138 = vector.extract_strided_slice %132 {offsets = [1, 0], sizes = [1, 128], strides = [1, 1]} : vector<3x128xf32> to vector<1x128xf32>
    %139 = vector.extract_strided_slice %132 {offsets = [2, 0], sizes = [1, 128], strides = [1, 1]} : vector<3x128xf32> to vector<1x128xf32>
    %cst_41 = arith.constant dense<0.000000e+00> : vector<128xf32>
    %140 = vector.multi_reduction <add>, %137, %cst_41 [0] : vector<8x128xf32> to vector<128xf32>
    %141 = vector.shape_cast %140 : vector<128xf32> to vector<1x128xf32>
    %142 = arith.mulf %137, %137 : vector<8x128xf32>
    %cst_42 = arith.constant dense<0.000000e+00> : vector<128xf32>
    %143 = vector.multi_reduction <add>, %142, %cst_42 [0] : vector<8x128xf32> to vector<128xf32>
    %144 = vector.shape_cast %143 : vector<128xf32> to vector<1x128xf32>
    %cst_43 = arith.constant 1.250000e-01 : f32
    %145 = vector.broadcast %cst_43 : f32 to vector<1x128xf32>
    %146 = arith.mulf %141, %145 : vector<1x128xf32>
    %cst_44 = arith.constant 1.250000e-01 : f32
    %147 = vector.broadcast %cst_44 : f32 to vector<1x128xf32>
    %148 = arith.mulf %144, %147 : vector<1x128xf32>
    %149 = arith.mulf %146, %146 : vector<1x128xf32>
    %150 = arith.subf %148, %149 : vector<1x128xf32>
    %cst_45 = arith.constant 9.99999974E-6 : f32
    %151 = vector.broadcast %cst_45 : f32 to vector<1x128xf32>
    %152 = arith.addf %150, %151 : vector<1x128xf32>
    %153 = math.rsqrt %152 : vector<1x128xf32>
    %154 = arith.mulf %138, %153 : vector<1x128xf32>
    %155 = vector.broadcast %154 : vector<1x128xf32> to vector<8x128xf32>
    %156 = arith.mulf %137, %155 : vector<8x128xf32>
    %157 = arith.mulf %146, %154 : vector<1x128xf32>
    %158 = arith.subf %139, %157 : vector<1x128xf32>
    %159 = vector.broadcast %158 : vector<1x128xf32> to vector<8x128xf32>
    %160 = arith.addf %156, %159 : vector<8x128xf32>
    %cst_46 = arith.constant 2.000000e-01 : f32
    %161 = vector.broadcast %cst_46 : f32 to vector<8x128xf32>
    %162 = arith.mulf %161, %160 : vector<8x128xf32>
    %163 = arith.maximumf %160, %162 : vector<8x128xf32>
    %cst_47 = arith.constant dense<0xFF800000> : vector<8xf32>
    %164 = vector.multi_reduction <maximumf>, %163, %cst_47 [1] : vector<8x128xf32> to vector<8xf32>
    %165 = vector.shape_cast %164 : vector<8xf32> to vector<8x1xf32>
    %166 = vector.broadcast %165 : vector<8x1xf32> to vector<8x128xf32>
    %167 = arith.subf %163, %166 : vector<8x128xf32>
    %168 = math.exp %167 : vector<8x128xf32>
    %169 = arith.mulf %168, %0 : vector<8x128xf32>
    %cst_48 = arith.constant dense<0.000000e+00> : vector<8xf32>
    %170 = vector.multi_reduction <add>, %169, %cst_48 [1] : vector<8x128xf32> to vector<8xf32>
    %171 = vector.shape_cast %170 : vector<8xf32> to vector<8x1xf32>
    %172 = tpu.reciprocal %171 : vector<8x1xf32> -> vector<8x1xf32>
    %173 = vector.broadcast %172 : vector<8x1xf32> to vector<8x128xf32>
    %174 = arith.mulf %169, %173 : vector<8x128xf32>
    %c0_49 = arith.constant 0 : index
    %c0_50 = arith.constant 0 : index
    %175 = vector.load %arg5[%c0_49, %c0_50] : memref<8x128xf32, #tpu.memory_space<vmem>>, vector<8x128xf32>
    tpu.vector_store %arg5[%c0_49, %c0_50], %174 {strides = array<i32>} : memref<8x128xf32, #tpu.memory_space<vmem>>, vector<8x128xf32>,
    return
  }
}

</mosaic_0001>

<bundles_post_ra>
// kernel: tpu_custom_call.1
= control target key start
LH: loop header
LB: loop body
LE: loop exit
PB: predicated region body
PF: predicated region fallthrough
CT: control target
= control target key end

     0   :  { %10 = vsyncpa [#allocation5], 0  ;;  %s724_s0 = inlined_call_operand.hbm [shape: f32[3], index: 0, kind: input, shape index: {}]   ;;  %s725_s1 = inlined_call_operand.hbm [shape: f32[8,128], index: 1, kind: input, shape index: {}]   ;;  %s726_s2 = inlined_call_operand.hbm [shape: f32[8,5], index: 2, kind: input, shape index: {}]   ;;  %s727_s3 = inlined_call_operand.hbm [shape: f32[40,128], index: 3, kind: input, shape index: {}]   ;;  %s728_s4 = inlined_call_operand.hbm [shape: f32[32,128], index: 4, kind: input, shape index: {}]   ;;  %s729_s5 = inlined_call_operand.hbm [shape: f32[8,128], index: 5, kind: output, shape index: {}]  }
   0x1   :  { %11 = vsyncpa [#allocation3], 0 }
   0x2   :  { %12 = vsyncpa [#allocation8], 0 }
   0x3   :  { %13 = vsyncpa [#allocation11], 0  ;;  %s40_s20 = sshll.u32 %s726_s2, 4  ;;  %s41_s20 = int_to_ptr.hbm [resolvable:$true] %s40_s20 }
   0x4   :  { %14 = vsyncpa [#allocation4], 0  ;;  %s650_s21 = smov [#allocation7]   ;;  %s20_s25 = sshll.u32 %s724_s0, 4  ;;  %s21_s25 = int_to_ptr.hbm [resolvable:$true] %s20_s25 }
   0x5   :  { %s42_s22 = sshll.u32 %s650_s21, 4  ;;  %s651_s26 = smov [#allocation2]   ;;  %s43_s22 = int_to_ptr.vmem [resolvable:$true] %s42_s22 }
   0x6   :  { %45 = dma.hbm_to_vmem [thread:$0]  %s41_s20, 128, %s43_s22, [#allocation8]  }
   0x7   :  { %23 = dma.hbm_to_smem %s21_s25, 16, %s651_s26, [#allocation5]  }
   0x8   :  { %s29_s29 = sshll.u32 %s725_s1, 4  ;;  %s652_s30 = smov [#allocation6]   ;;  %s30_s29 = int_to_ptr.hbm [resolvable:$true] %s29_s29 }
   0x9   :  { %s31_s2 = sshll.u32 %s652_s30, 4  ;;  %s50_s8 = sshll.u32 %s727_s3, 4  ;;  %s32_s2 = int_to_ptr.vmem [resolvable:$true] %s31_s2  ;;  %s51_s8 = int_to_ptr.hbm [resolvable:$true] %s50_s8 }
   0xa   :  { %34 = dma.hbm_to_vmem [thread:$0]  %s30_s29, 128, %s32_s2, [#allocation3]  }
   0xb   :  { %s653_s9 = smov [#allocation9]   ;;  %s654_s10 = smov 128  }
   0xc   :  { %s52_s0 = sshll.u32 %s653_s9, 4  ;;  %s655_s11 = smov 8   ;;  %s53_s0 = int_to_ptr.vmem [resolvable:$true] %s52_s0 }
   0xd   :  { %58 = dma.hbm_to_vmem [thread:$0]  %s51_s8, 640, %s53_s0, [#allocation8], %s654_s10, %s654_s10, %s655_s11  }
   0xe   :  { %s63_s1 = sshll.u32 %s728_s4, 4  ;;  %s656_s14 = smov [#allocation10]   ;;  %s64_s1 = int_to_ptr.hbm [resolvable:$true] %s63_s1 }
   0xf   :  { %s65_s15 = sshll.u32 %s656_s14, 4  ;;  %s66_s15 = int_to_ptr.vmem [resolvable:$true] %s65_s15 }
  0x10   :  { %71 = dma.hbm_to_vmem [thread:$0]  %s64_s1, 512, %s66_s15, [#allocation11], %s654_s10, %s654_s10, %s655_s11  }
  0x11   :  { %640 = dma.done.wait [#allocation5], 16  }
  0x12   :  { %641 = vsyncadd [#allocation5], 4294967280 }
  0x13   :  { %642 = dma.done.wait [#allocation3], 128  }
  0x14   :  { %643 = vsyncadd [#allocation3], 4294967168 }
  0x15   :  { %644 = dma.done.wait [#allocation8], 768  }
  0x16   :  { %645 = vsyncadd [#allocation8], 4294966528 }
  0x17   :  { %646 = dma.done.wait [#allocation11], 512  }
  0x18   :  { %647 = vsyncadd [#allocation11], 4294966784 }
  0x19   :  { %92 = sfence }
  0x1a   :  { %v96_v0 = vld [vmem:[#allocation9] sm:$0x1f]  ;;  %vm102_vm0 = vcmask 1044480   ;;  %v94_v1 = vld [vmem:[#allocation7] sm:$0xff]  ;;  %vm98_vm1 = vcmask 39936   ;;  %vm126_vm2 = vcmask 23552  }
  0x1b   :  { %469 = vmatpush.msk.msra.mxu0 %vm102_vm0, %v96_v0  ;;  %v95_v2 = vld [vmem:[#allocation9 + $0x8] sm:$0x7]  ;;  %v170_v24 = vld [vmem:[#allocation9 + $0x10] sm:$0x7]  ;;  %vm175_vm3 = vcmask 1042432   ;;  %s473_s3 = sld [smem:[#allocation2 + $0x1]] }
  0x1c   :  { %470 = vmatmul.msk.f32.vlgmr.msra.gmra.mxu0 %vm98_vm1, %v94_v1  ;;  %v97_v3 = vperm.slane %v95_v2, 0  ;;  %471 = vmatpush.msk.msra.mxu1 %vm175_vm3, %v170_v24  ;;  %v169_v44 = vld [vmem:[#allocation9 + $0x18] sm:$0x7]  ;;  %s263_s4 = sld [smem:[#allocation2]]  ;;  %s660_s17 = smov [#allocation12]  }
  0x1d   :  { %v171_v45 = vperm.slane %v169_v44, 0  ;;  %s474_s16 = sld [smem:[#allocation2 + $0x2]]  ;;  %s454_s18 = sshll.u32 %s660_s17, 4  ;;  %s455_s18 = int_to_ptr.vmem [resolvable:$true] %s454_s18 }
  0x1e   :  { %s456_s21 = sshll.u32 %s729_s5, 4  ;;  %s457_s21 = int_to_ptr.hbm [resolvable:$true] %s456_s21 }
  0x99   :  { %v123_v4 = vpop.f32.mrf.mxu0 }
  0x9a   :  { %v124_v5 = vadd.f32 %v123_v4, %v97_v3  ;;  %v658_v3 = vmov 0  }
  0x9b   :  { %488 = vset.pattern.permute.xlu0 %v658_v3 }
  0x9c   :  { %v127_v6 = vsel %vm126_vm2, %v124_v5, 0.0  ;;  %v134_v7 = vmul.f32 %v124_v5, %v124_v5 }
  0x9d   :  { %v128_v8 = vrot.slane %v127_v6, 4 }
  0x9e   :  { %v135_v9 = vsel %vm126_vm2, %v134_v7, 0.0 }
  0x9f   :  { %v129_v10 = vadd.f32 %v128_v8, %v127_v6  ;;  %v136_v11 = vrot.slane %v135_v9, 4 }
  0xa1   :  { %v130_v12 = vrot.slane %v129_v10, 2  ;;  %v137_v13 = vadd.f32 %v136_v11, %v135_v9 }
  0xa3   :  { %v131_v14 = vadd.f32 %v130_v12, %v129_v10  ;;  %v138_v15 = vrot.slane %v137_v13, 2 }
  0xa5   :  { %v132_v16 = vrot.slane %v131_v14, 1  ;;  %v139_v17 = vadd.f32 %v138_v15, %v137_v13 }
  0xa7   :  { %v133_v18 = vadd.f32 %v132_v16, %v131_v14  ;;  %v140_v19 = vrot.slane %v139_v17, 1 }
  0xa9   :  { %v141_v20 = vadd.f32 %v140_v19, %v139_v17  ;;  %v142_v21 = vmul.f32 0.125, %v133_v18 }
  0xab   :  { %v143_v22 = vmul.f32 0.125, %v141_v20  ;;  %v144_v23 = vmul.f32 %v142_v21, %v142_v21 }
  0xad   :  { %v145_v25 = vsub.f32 %v143_v22, %v144_v23  ;;  %v659_v23 = vmov 1  }
  0xaf   :  { %v146_v26 = vadd.f32 1e-05, %v145_v25  ;;  %v241_v25 = vld [vmem:[#allocation10] sm:$0x7] }
  0xb1   :  { %492 = vrsqrt.f32 %v146_v26  ;;  %vm153_vm5 = vweird.f32 %v146_v26 }
  0xb7   :  { %v493_v27 = vpop.eup %492 }
  0xb8   :  { %v148_v28 = vmul.f32 %v493_v27, %v146_v26  ;;  %vm154_vm4 = vweird.f32 %v493_v27  ;;  %v292_v26 = vld [vmem:[#allocation10 + $0x8] sm:$0x1f] }
  0xb9   :  { %vm155_vm6 = vmor %vm153_vm5, %vm154_vm4  ;;  %309 = vmatpush.xpose.msra.mxu2 %v292_v26 }
  0xba   :  { %v149_v29 = vmul.f32 %v493_v27, %v148_v28  ;;  %v253_v28 = vperm.slane %v241_v25, 1 }
  0xbc   :  { %v150_v30 = vmul.f32 0.5, %v149_v29  ;;  %v260_v29 = vperm.slane %v241_v25, 2 }
  0xbe   :  { %v151_v31 = vsub.f32 1.5, %v150_v30 }
  0xc0   :  { %v152_v32 = vmul.f32 %v493_v27, %v151_v31 }
  0xc2   :  { %v156_v33 = vsel %vm155_vm6, %v493_v27, %v152_v32  ;;  %v247_v27 = vperm.slane %v241_v25, 0 }
  0xc3   :  { %v157_v34 = vmul.f32 %v156_v33, %v95_v2 }
  0xc5   :  { %v160_v35 = vmul.f32 %v157_v34, %v142_v21  ;;  %v158_v36 = vperm.slane %v157_v34, 1  ;;  %v267_v34 = vstv %s473_s3 }
  0xc7   :  { %v162_v37 = vrot.slane %v160_v35, 7  ;;  %v159_v39 = vmul.f32 %v158_v36, %v124_v5  ;;  %v713_v35 = vld [vmem:[#allocation6] sm:$0xff] }
  0xc9   :  { %v164_v38 = vsub.f32 %v95_v2, %v162_v37  ;;  %v657_v2 = vmov 2  }
  0xca   :  { %490 = vset.pattern.permute.xlu1 %v657_v2 }
  0xcb   :  { %v165_v40 = vperm.slane %v164_v38, 2  ;;  %v264_v38 = vstv %s263_s4 }
  0xcd   :  { %v166_v41 = vadd.f32 %v165_v40, %v159_v39  ;;  %v268_v40 = vmul.f32 %v267_v34, %v713_v35 }
  0xcf   :  { %v167_v42 = vmul.f32 0.2, %v166_v41 }
  0xd1   :  { %v168_v43 = vmax.f32 %v166_v41, %v167_v42  ;;  %v271_v42 = vstv %s474_s16 }
  0xd3   :  { %472 = vmatmul.msk.f32.vlgmr.msra.gmra.mxu1 %vm126_vm2, %v168_v43 }
 0x150   :  { %v196_v46 = vpop.f32.mrf.mxu1 }
 0x151   :  { %v197_v47 = vadd.f32 %v196_v46, %v171_v45 }
 0x153   :  { %v199_v48 = vsel %vm126_vm2, %v197_v47, 0.0  ;;  %v206_v49 = vmul.f32 %v197_v47, %v197_v47 }
 0x154   :  { %v200_v50 = vrot.slane %v199_v48, 4 }
 0x155   :  { %v207_v51 = vsel %vm126_vm2, %v206_v49, 0.0 }
 0x156   :  { %v201_v52 = vadd.f32 %v200_v50, %v199_v48  ;;  %v208_v53 = vrot.slane %v207_v51, 4 }
 0x158   :  { %v202_v54 = vrot.slane %v201_v52, 2  ;;  %v209_v55 = vadd.f32 %v208_v53, %v207_v51 }
 0x15a   :  { %v203_v56 = vadd.f32 %v202_v54, %v201_v52  ;;  %v210_v57 = vrot.slane %v209_v55, 2 }
 0x15c   :  { %v204_v58 = vrot.slane %v203_v56, 1  ;;  %v211_v59 = vadd.f32 %v210_v57, %v209_v55 }
 0x15e   :  { %v205_v60 = vadd.f32 %v204_v58, %v203_v56  ;;  %v212_v61 = vrot.slane %v211_v59, 1 }
 0x160   :  { %v213_v62 = vadd.f32 %v212_v61, %v211_v59  ;;  %v214_v63 = vmul.f32 0.125, %v205_v60  ;;  %v291_v59 = vld [vmem:[#allocation9 + $0x20] sm:$0x7] }
 0x161   :  { %v293_v60 = vperm.slane %v291_v59, 0 }
 0x162   :  { %v215_v0 = vmul.f32 0.125, %v213_v62  ;;  %v216_v1 = vmul.f32 %v214_v63, %v214_v63 }
 0x164   :  { %v217_v4 = vsub.f32 %v215_v0, %v216_v1 }
 0x166   :  { %v218_v5 = vadd.f32 1e-05, %v217_v4 }
 0x168   :  { %494 = vrsqrt.f32 %v218_v5  ;;  %vm225_vm8 = vweird.f32 %v218_v5 }
 0x16e   :  { %v495_v6 = vpop.eup %494 }
 0x16f   :  { %v220_v7 = vmul.f32 %v495_v6, %v218_v5  ;;  %vm226_vm7 = vweird.f32 %v495_v6 }
 0x170   :  { %vm227_vm9 = vmor %vm225_vm8, %vm226_vm7 }
 0x171   :  { %v221_v8 = vmul.f32 %v495_v6, %v220_v7 }
 0x173   :  { %v222_v9 = vmul.f32 0.5, %v221_v8 }
 0x175   :  { %v223_v10 = vsub.f32 1.5, %v222_v9 }
 0x177   :  { %v224_v11 = vmul.f32 %v495_v6, %v223_v10 }
 0x179   :  { %v228_v12 = vsel %vm227_vm9, %v495_v6, %v224_v11 }
 0x17a   :  { %v229_v13 = vmul.f32 %v228_v12, %v169_v44 }
 0x17c   :  { %v232_v14 = vmul.f32 %v229_v13, %v214_v63  ;;  %v230_v15 = vperm.slane %v229_v13, 1 }
 0x17e   :  { %v234_v16 = vrot.slane %v232_v14, 7  ;;  %v231_v18 = vmul.f32 %v230_v15, %v197_v47 }
 0x180   :  { %v236_v17 = vsub.f32 %v169_v44, %v234_v16 }
 0x182   :  { %v237_v19 = vperm.slane %v236_v17, 2  ;;  %v357_v17 = vld [vmem:[#allocation10 + $0x10] sm:$0x1f] }
 0x183   :  { %475 = vmatpush.msk.msra.mxu3 %vm102_vm0, %v357_v17 }
 0x184   :  { %v238_v20 = vadd.f32 %v237_v19, %v231_v18 }
 0x186   :  { %v239_v21 = vmul.f32 0.2, %v238_v20 }
 0x188   :  { %v240_v22 = vmax.f32 %v238_v20, %v239_v21 }
 0x18a   :  { %257 = vperm.xlu1 %490, %v240_v22   ;;  %244 = vperm.xlu0 %488, %v240_v22  }
 0x192   :  { %489 = vset.pattern.permute.xlu0 %v659_v23 }
 0x193   :  { %250 = vperm.xlu0 %489, %v240_v22  }
 0x19b   :  { %491 = vset.pattern.permute.xlu0 %v657_v2 }
 0x1fc   :  { %v245_v24 = vpop.permute.xlu0 %244  ;;  %v258_v30 = vpop.permute.xlu1 %257 }
 0x1fd   :  { %v248_v32 = vmul.f32 %v247_v27, %v245_v24  ;;  %v261_v36 = vmul.f32 %v260_v29, %v258_v30 }
 0x205   :  { %v251_v31 = vpop.permute.xlu0 %250 }
 0x206   :  { %v254_v33 = vmul.f32 %v253_v28, %v251_v31 }
 0x208   :  { %v255_v37 = vadd.f32 %v254_v33, %v248_v32 }
 0x20a   :  { %v262_v39 = vadd.f32 %v261_v36, %v255_v37 }
 0x20c   :  { %v265_v41 = vmul.f32 %v264_v38, %v262_v39  ;;  %v356_v38 = vld [vmem:[#allocation10 + $0x18] sm:$0x7] }
 0x20d   :  { %v358_v39 = vperm.slane %v356_v38, 0 }
 0x20e   :  { %v269_v43 = vadd.f32 %v268_v40, %v265_v41 }
 0x210   :  { %v272_v44 = vadd.f32 %v271_v42, %v269_v43 }
 0x212   :  { %v273_v45 = vsub.f32 0.0, %v272_v44 }
 0x214   :  { %v274_v46 = vmul.f32 1.442695, %v273_v45 }
 0x216   :  { %496 = vpow2.f32 %v274_v46 }
 0x21c   :  { %v497_v47 = vpop.eup %496 }
 0x21d   :  { %v276_v48 = vadd.f32 1.0, %v497_v47 }
 0x21f   :  { %498 = vrcp.f32 %v276_v48  ;;  %v288_v52 = vand.u32 2147483648, %v276_v48  ;;  %v286_v54 = vand.u32 2147483647, %v276_v48  ;;  %vm282_vm11 = vweird.f32 %v276_v48 }
 0x221   :  { %v289_v56 = vor.u32 1.1754944e-38, %v288_v52  ;;  %vm287_vm13 = vcmp.eq.f32.partialorder %v286_v54, 8.507059e+37 }
 0x225   :  { %v499_v49 = vpop.eup %498 }
 0x226   :  { %v278_v50 = vmul.f32 %v499_v49, %v276_v48  ;;  %vm283_vm10 = vweird.f32 %v499_v49 }
 0x227   :  { %vm284_vm12 = vmor %vm282_vm11, %vm283_vm10 }
 0x228   :  { %v279_v51 = vsub.f32 1.0, %v278_v50 }
 0x22a   :  { %v280_v53 = vmul.f32 %v499_v49, %v279_v51 }
 0x22c   :  { %v281_v55 = vadd.f32 %v499_v49, %v280_v53 }
 0x22e   :  { %v285_v57 = vsel %vm284_vm12, %v499_v49, %v281_v55 }
 0x22f   :  { %v290_v58 = vsel %vm287_vm13, %v289_v56, %v285_v57 }
 0x230   :  { %310 = vmatmul.f32.vlgmr.msra.gmra.mxu2 %v290_v58 }
 0x2b3   :  { %v311_v61 = vpop.f32.mrf.mxu2 }
 0x2b4   :  { %v312_v62 = vadd.f32 %v311_v61, %v293_v60 }
 0x2b6   :  { %v314_v63 = vsel %vm98_vm1, %v312_v62, 0.0  ;;  %v321_v0 = vmul.f32 %v312_v62, %v312_v62 }
 0x2b7   :  { %v315_v1 = vrot.slane %v314_v63, 4 }
 0x2b8   :  { %v322_v2 = vsel %vm98_vm1, %v321_v0, 0.0 }
 0x2b9   :  { %v316_v3 = vadd.f32 %v315_v1, %v314_v63  ;;  %v323_v4 = vrot.slane %v322_v2, 4 }
 0x2bb   :  { %v317_v5 = vrot.slane %v316_v3, 2  ;;  %v324_v6 = vadd.f32 %v323_v4, %v322_v2 }
 0x2bd   :  { %v318_v7 = vadd.f32 %v317_v5, %v316_v3  ;;  %v325_v8 = vrot.slane %v324_v6, 2 }
 0x2bf   :  { %v319_v9 = vrot.slane %v318_v7, 1  ;;  %v326_v10 = vadd.f32 %v325_v8, %v324_v6 }
 0x2c1   :  { %v320_v11 = vadd.f32 %v319_v9, %v318_v7  ;;  %v327_v12 = vrot.slane %v326_v10, 1 }
 0x2c3   :  { %v328_v13 = vadd.f32 %v327_v12, %v326_v10  ;;  %v329_v14 = vmul.f32 0.125, %v320_v11 }
 0x2c5   :  { %v330_v15 = vmul.f32 0.125, %v328_v13  ;;  %v331_v16 = vmul.f32 %v329_v14, %v329_v14 }
 0x2c7   :  { %v332_v18 = vsub.f32 %v330_v15, %v331_v16 }
 0x2c9   :  { %v333_v19 = vadd.f32 1e-05, %v332_v18 }
 0x2cb   :  { %500 = vrsqrt.f32 %v333_v19  ;;  %vm340_vm15 = vweird.f32 %v333_v19 }
 0x2d1   :  { %v501_v20 = vpop.eup %500 }
 0x2d2   :  { %v335_v21 = vmul.f32 %v501_v20, %v333_v19  ;;  %vm341_vm14 = vweird.f32 %v501_v20 }
 0x2d3   :  { %vm342_vm2 = vmor %vm340_vm15, %vm341_vm14 }
 0x2d4   :  { %v336_v22 = vmul.f32 %v501_v20, %v335_v21 }
 0x2d6   :  { %v337_v23 = vmul.f32 0.5, %v336_v22 }
 0x2d8   :  { %v338_v24 = vsub.f32 1.5, %v337_v23 }
 0x2da   :  { %v339_v25 = vmul.f32 %v501_v20, %v338_v24 }
 0x2dc   :  { %v343_v26 = vsel %vm342_vm2, %v501_v20, %v339_v25 }
 0x2dd   :  { %v344_v27 = vmul.f32 %v343_v26, %v291_v59 }
 0x2df   :  { %v347_v28 = vmul.f32 %v344_v27, %v329_v14  ;;  %v345_v29 = vperm.slane %v344_v27, 1 }
 0x2e1   :  { %v349_v30 = vrot.slane %v347_v28, 7  ;;  %v346_v32 = vmul.f32 %v345_v29, %v312_v62 }
 0x2e3   :  { %v351_v31 = vsub.f32 %v291_v59, %v349_v30 }
 0x2e5   :  { %v352_v33 = vperm.slane %v351_v31, 2 }
 0x2e7   :  { %v353_v34 = vadd.f32 %v352_v33, %v346_v32 }
 0x2e9   :  { %v354_v36 = vmul.f32 0.2, %v353_v34 }
 0x2eb   :  { %v355_v37 = vmax.f32 %v353_v34, %v354_v36 }
 0x2ed   :  { %476 = vmatmul.msk.f32.vlgmr.msra.gmra.mxu3 %vm98_vm1, %v355_v37 }
 0x370   :  { %v382_v40 = vpop.f32.mrf.mxu3 }
 0x371   :  { %v383_v41 = vadd.f32 %v382_v40, %v358_v39 }
 0x373   :  { %v385_v42 = vrot.slane %v383_v41, 4  ;;  %v391_v43 = vmul.f32 %v383_v41, %v383_v41 }
 0x375   :  { %v386_v44 = vadd.f32 %v385_v42, %v383_v41  ;;  %v392_v45 = vrot.slane %v391_v43, 4 }
 0x377   :  { %v387_v46 = vrot.slane %v386_v44, 2  ;;  %v393_v47 = vadd.f32 %v392_v45, %v391_v43 }
 0x379   :  { %v388_v48 = vadd.f32 %v387_v46, %v386_v44  ;;  %v394_v49 = vrot.slane %v393_v47, 2 }
 0x37b   :  { %v389_v50 = vrot.slane %v388_v48, 1  ;;  %v395_v51 = vadd.f32 %v394_v49, %v393_v47 }
 0x37d   :  { %v390_v52 = vadd.f32 %v389_v50, %v388_v48  ;;  %v396_v53 = vrot.slane %v395_v51, 1 }
 0x37f   :  { %v397_v54 = vadd.f32 %v396_v53, %v395_v51  ;;  %v398_v55 = vmul.f32 0.125, %v390_v52 }
 0x381   :  { %v399_v56 = vmul.f32 0.125, %v397_v54  ;;  %v400_v57 = vmul.f32 %v398_v55, %v398_v55 }
 0x383   :  { %v401_v58 = vsub.f32 %v399_v56, %v400_v57 }
 0x385   :  { %v402_v59 = vadd.f32 1e-05, %v401_v58 }
 0x387   :  { %502 = vrsqrt.f32 %v402_v59  ;;  %vm409_vm1 = vweird.f32 %v402_v59 }
 0x38d   :  { %v503_v60 = vpop.eup %502 }
 0x38e   :  { %v404_v61 = vmul.f32 %v503_v60, %v402_v59  ;;  %vm410_vm0 = vweird.f32 %v503_v60 }
 0x38f   :  { %vm411_vm3 = vmor %vm409_vm1, %vm410_vm0 }
 0x390   :  { %v405_v62 = vmul.f32 %v503_v60, %v404_v61 }
 0x392   :  { %v406_v63 = vmul.f32 0.5, %v405_v62 }
 0x394   :  { %v407_v0 = vsub.f32 1.5, %v406_v63 }
 0x396   :  { %v408_v1 = vmul.f32 %v503_v60, %v407_v0 }
 0x398   :  { %v412_v2 = vsel %vm411_vm3, %v503_v60, %v408_v1 }
 0x399   :  { %v413_v3 = vmul.f32 %v412_v2, %v356_v38 }
 0x39b   :  { %v416_v4 = vmul.f32 %v413_v3, %v398_v55  ;;  %v414_v5 = vperm.slane %v413_v3, 1 }
 0x39d   :  { %v418_v6 = vrot.slane %v416_v4, 7  ;;  %v415_v8 = vmul.f32 %v414_v5, %v383_v41 }
 0x39f   :  { %v420_v7 = vsub.f32 %v356_v38, %v418_v6 }
 0x3a1   :  { %v421_v9 = vperm.slane %v420_v7, 2 }
 0x3a3   :  { %v422_v10 = vadd.f32 %v421_v9, %v415_v8 }
 0x3a5   :  { %v423_v11 = vmul.f32 0.2, %v422_v10 }
 0x3a7   :  { %v424_v12 = vmax.f32 %v422_v10, %v423_v11 }
 0x3a9   :  { %425 = vmax.xlane.f32.xlu1 %v424_v12 }
 0x41c   :  { %v426_v13 = vpop.xlane.xlu1 %425 }
 0x41d   :  { %v427_v14 = vsub.f32 %v424_v12, %v426_v13 }
 0x41f   :  { %v428_v15 = vmul.f32 1.442695, %v427_v14 }
 0x421   :  { %504 = vpow2.f32 %v428_v15 }
 0x427   :  { %v505_v16 = vpop.eup %504 }
 0x428   :  { %v430_v17 = vmul.f32 %v505_v16, %v713_v35 }
 0x42a   :  { %431 = vadd.xlane.f32.xlu2 %v430_v17 }
 0x49d   :  { %v432_v18 = vpop.xlane.xlu2 %431 }
 0x49e   :  { %506 = vrcp.f32 %v432_v18  ;;  %v444_v22 = vand.u32 2147483648, %v432_v18  ;;  %v442_v24 = vand.u32 2147483647, %v432_v18  ;;  %vm438_vm5 = vweird.f32 %v432_v18 }
 0x4a0   :  { %v445_v26 = vor.u32 1.1754944e-38, %v444_v22  ;;  %vm443_vm7 = vcmp.eq.f32.partialorder %v442_v24, 8.507059e+37 }
 0x4a4   :  { %v507_v19 = vpop.eup %506 }
 0x4a5   :  { %v434_v20 = vmul.f32 %v507_v19, %v432_v18  ;;  %vm439_vm4 = vweird.f32 %v507_v19 }
 0x4a6   :  { %vm440_vm6 = vmor %vm438_vm5, %vm439_vm4 }
 0x4a7   :  { %v435_v21 = vsub.f32 1.0, %v434_v20 }
 0x4a9   :  { %v436_v23 = vmul.f32 %v507_v19, %v435_v21 }
 0x4ab   :  { %v437_v25 = vadd.f32 %v507_v19, %v436_v23 }
 0x4ad   :  { %v441_v35 = vsel %vm440_vm6, %v507_v19, %v437_v25 }
 0x4ae   :  { %v446_v27 = vsel %vm443_vm7, %v445_v26, %v441_v35 }
 0x4af   :  { %v447_v28 = vmul.f32 %v446_v27, %v430_v17 }
 0x4b1   :  { %448 = vst [vmem:[#allocation12] sm:$0xff] %v447_v28 }
 0x4b2   :  { %459 = dma.vmem_to_hbm [thread:$0]  %s455_s18, 128, %s457_s21, [#allocation4]  }
 0x4b3   :  { %648 = dma.done.wait [#allocation4], 128  }
 0x4b4   :  { %649 = vsyncadd [#allocation4], 4294967168 }
 0x4b5   :  { %464 = vsyncpa [#allocation3], 1 }
 0x4b6   :  { %465 = vsyncpa [#allocation8], 1 }
 0x4b7   :  { %466 = vsyncpa [#allocation11], 1 }
 0x4b8   :  { %467 = vsyncpa [#allocation4], 1 }
 0x4b9   :  { %468 = vsyncpa [#allocation5], 1 }

</bundles_post_ra>
